<compile_context>
chip_gen: v6e
topology: v6e:2x2x1
jax: 0.10.0
libtpu: 0.0.40
codegen_flags: <defaults>
</compile_context>

<pallas_src>
import functools

import jax
import jax.numpy as jnp
from jax.experimental import pallas as pl
from jax.experimental.pallas import tpu as pltpu

_TM_MAX = 1024     # max rows of x per grid step
_TK_MAX = 2048     # max K tile in the (rare) K-tiled fallback path
_RANK_PAD = 128    # LoRA rank padded to one full lane group
_LANE = 128


def _round_up(x, m):
    return (x + m - 1) // m * m


def _vmem_capacity_bytes():
    """Physical VMEM per core; conservative fallback if the query fails."""
    try:
        cap = getattr(pltpu.get_tpu_info(), "vmem_capacity_bytes", None)
        if cap:
            return int(cap)
    except Exception:
        pass
    return 64 * 1024 * 1024  # v7x per-TensorCore VMEM (most restrictive)


# ----------------------------------------------------------------------------
# Kernels
# ----------------------------------------------------------------------------
def _lora_kernel_fullk(x_ref, downt_ref, upt_ref, o_ref):
    """Full-K path: one grid axis over M; both factors VMEM-resident."""
    x = x_ref[...].astype(downt_ref.dtype)          # cast on VPU, hides under DMA
    h = jnp.dot(x, downt_ref[...], preferred_element_type=jnp.float32)
    o_ref[...] = jnp.dot(h.astype(upt_ref.dtype), upt_ref[...],
                         preferred_element_type=jnp.float32).astype(o_ref.dtype)


def _lora_kernel_ktiled(x_ref, downt_ref, upt_ref, o_ref, h_acc, *, tk):
    """Fallback for very large in_features: K grid axis with f32 accumulator.

    down^T is resident in VMEM (constant block index) and sliced in-kernel,
    so it is DMA'd from HBM exactly once.
    """
    k = pl.program_id(1)

    @pl.when(k == 0)
    def _():
        h_acc[...] = jnp.zeros_like(h_acc)

    start = pl.multiple_of(k * tk, tk)
    d_blk = downt_ref[pl.ds(start, tk), :]
    h_acc[...] += jnp.dot(x_ref[...].astype(d_blk.dtype), d_blk,
                          preferred_element_type=jnp.float32)

    @pl.when(k == pl.num_programs(1) - 1)
    def _():
        o_ref[...] = jnp.dot(h_acc[...].astype(upt_ref.dtype), upt_ref[...],
                             preferred_element_type=jnp.float32
                             ).astype(o_ref.dtype)


# ----------------------------------------------------------------------------
# One-time factor construction (per weight_embedding update).
# Mirrors LoRALinearLayer.forward's `down = down_weight @ down_aux`,
# `up = up_aux @ up_weight` (1-D embedding path), pre-transposed, padded and
# cast to the compute dtype, with network_alpha/rank folded into `up`.
# TODO(synk): 2-D (per-batch) weight_embedding path (batched einsum LoRA) is
#             not implemented; only the shared 1-D embedding path is.
# ----------------------------------------------------------------------------
def prepare_lora_factors(weight_embedding, down_aux, up_aux, rank, down_dim,
                         up_dim, network_alpha=None,
                         compute_dtype=jnp.bfloat16):
    in_features = down_aux.shape[1]
    out_features = up_aux.shape[0]

    dw = weight_embedding[: down_dim * rank].reshape(rank, down_dim)
    uw = weight_embedding[down_dim * rank:].reshape(up_dim, rank)
    down = dw @ down_aux                    # (rank, in_features)
    up = up_aux @ uw                        # (out_features, rank)
    if network_alpha is not None:
        up = up * (network_alpha / rank)    # fold scale into the up factor

    r_pad = _round_up(rank, _RANK_PAD)
    n_pad = _round_up(out_features, _LANE)  # lane-dense output stores

    downt = jnp.zeros((in_features, r_pad), compute_dtype)
    downt = downt.at[:, :rank].set(down.T.astype(compute_dtype))
    upt = jnp.zeros((r_pad, n_pad), compute_dtype)
    upt = upt.at[:rank, :out_features].set(up.T.astype(compute_dtype))
    return downt, upt, out_features


def _pick_tk(in_features, tk_max):
    """Largest 128-multiple tile <= tk_max that divides in_features."""
    t = min(tk_max, _round_up(in_features, _LANE))
    t = (t // _LANE) * _LANE
    while t >= _LANE:
        if in_features % t == 0:
            return t, False
        t -= _LANE
    return min(tk_max, _round_up(in_features, _LANE)), True  # needs K padding


# ----------------------------------------------------------------------------
# Forward (hot path).  x: (..., in_features) -> (..., out_features)
# ----------------------------------------------------------------------------
def lora_linear_forward(x, downt, upt, out_features):
    orig_dtype = x.dtype
    compute_dtype = downt.dtype
    in_features, r_pad = downt.shape
    n_pad = upt.shape[1]
    assert x.shape[-1] == in_features

    x2d = x.reshape(-1, in_features)        # original dtype; cast in-kernel
    m = x2d.shape[0]

    x_isz = jnp.dtype(x2d.dtype).itemsize
    w_isz = jnp.dtype(compute_dtype).itemsize
    o_isz = jnp.dtype(orig_dtype).itemsize

    # Per-chip VMEM budget: ~48 MiB on v7x (64 MiB), ~96 MiB on v5e/v6e (128).
    budget = int(0.75 * _vmem_capacity_bytes())

    # Resident factors (count x2 for the pipeline's buffer pair).
    resident = 2 * (downt.size + upt.size) * w_isz

    def fits_fullk(tm):
        per_step = (2 * tm * in_features * x_isz      # x double buffer
                    + 2 * tm * n_pad * o_isz          # output double buffer
                    + tm * r_pad * 4)                 # f32 intermediate
        return resident + per_step <= budget

    cost = pl.CostEstimate(
        flops=2 * m * in_features * r_pad + 2 * m * r_pad * n_pad,
        transcendentals=0,
        bytes_accessed=(m * in_features * x_isz
                        + (downt.size + upt.size) * w_isz
                        + m * n_pad * o_isz),
    )

    tm = min(_TM_MAX, _round_up(m, 8))
    while tm > 8 and not fits_fullk(tm):
        tm = max(8, _round_up(tm // 2, 8))

    if fits_fullk(tm):
        # ------------------- preferred path: no K reduction axis ------------
        grid_m = pl.cdiv(m, tm)
        if grid_m == 1 and m >= 256:
            # Keep >=2 row tiles so both v7x TensorCores get work.
            tm = _round_up(pl.cdiv(m, 2), 8)
            grid_m = pl.cdiv(m, tm)

        out2d = pl.pallas_call(
            _lora_kernel_fullk,
            out_shape=jax.ShapeDtypeStruct((m, n_pad), orig_dtype),
            grid_spec=pltpu.PrefetchScalarGridSpec(
                num_scalar_prefetch=0,
                grid=(grid_m,),
                in_specs=[
                    # x row tile, full K, streamed per step (original dtype)
                    pl.BlockSpec((tm, in_features), lambda i: (i, 0)),
                    # down^T resident for the whole kernel
                    pl.BlockSpec((in_features, r_pad), lambda i: (0, 0)),
                    # up^T resident for the whole kernel
                    pl.BlockSpec((r_pad, n_pad), lambda i: (0, 0)),
                ],
                out_specs=pl.BlockSpec((tm, n_pad), lambda i: (i, 0)),
            ),
            compiler_params=pltpu.CompilerParams(
                dimension_semantics=("parallel",),
                vmem_limit_bytes=budget,
            ),
            cost_estimate=cost,
        )(x2d, downt, upt)
    else:
        # ------------- fallback: K-tiled reduction, resident down^T ---------
        tk, need_pad = _pick_tk(in_features, _TK_MAX)
        k_pad = _round_up(in_features, tk)
        if need_pad and k_pad != in_features:
            # Rare last resort (in_features with no 128-multiple divisor).
            x2d = jnp.pad(x2d, ((0, 0), (0, k_pad - in_features)))
            downt_b = jnp.pad(downt, ((0, k_pad - in_features), (0, 0)))
        else:
            k_pad = in_features
            downt_b = downt

        def fits_ktiled(tm_):
            per_step = (2 * tm_ * tk * x_isz
                        + 2 * tm_ * n_pad * o_isz
                        + tm_ * r_pad * 4)
            res = 2 * (k_pad * r_pad + upt.size) * w_isz
            return res + per_step <= budget

        tm = min(_TM_MAX, _round_up(m, 8))
        while tm > 8 and not fits_ktiled(tm):
            tm = max(8, _round_up(tm // 2, 8))

        grid = (pl.cdiv(m, tm), k_pad // tk)

        out2d = pl.pallas_call(
            functools.partial(_lora_kernel_ktiled, tk=tk),
            out_shape=jax.ShapeDtypeStruct((m, n_pad), orig_dtype),
            grid_spec=pltpu.PrefetchScalarGridSpec(
                num_scalar_prefetch=0,
                grid=grid,
                in_specs=[
                    pl.BlockSpec((tm, tk), lambda i, k: (i, k)),
                    # down^T resident (constant block index -> one DMA)
                    pl.BlockSpec((k_pad, r_pad), lambda i, k: (0, 0)),
                    pl.BlockSpec((r_pad, n_pad), lambda i, k: (0, 0)),
                ],
                out_specs=pl.BlockSpec((tm, n_pad), lambda i, k: (i, 0)),
                scratch_shapes=[pltpu.VMEM((tm, r_pad), jnp.float32)],
            ),
            compiler_params=pltpu.CompilerParams(
                dimension_semantics=("parallel", "arbitrary"),
                vmem_limit_bytes=budget,
            ),
            cost_estimate=cost,
        )(x2d, downt_b, upt)

    if n_pad != out_features:
        out2d = out2d[:, :out_features]
    return out2d.reshape(x.shape[:-1] + (out_features,))


# ----------------------------------------------------------------------------
# Example / self-check
# ----------------------------------------------------------------------------
if __name__ == "__main__":
    key = jax.random.PRNGKey(0)
    batch, seq = 2, 8
    in_features, out_features = 32, 32
    rank, down_dim, up_dim = 4, 160, 80
    network_alpha = 8.0

    k_x, k_da, k_ua, k_dw, k_uw = jax.random.split(key, 5)
    orth = jax.nn.initializers.orthogonal()

    # Buffers (orthogonal aux matrices), as in __init__.
    down_aux = orth(k_da, (down_dim, in_features), jnp.float32)
    up_aux = orth(k_ua, (out_features, up_dim), jnp.float32)

    # weight_embedding [(down_dim+up_dim)*rank]; train-time init zeroes the up
    # half (LoRA is a no-op) — use random values as if set via update_weight()
    # so the kernel path is actually exercised.
    down_w = jax.random.normal(k_dw, (rank, down_dim), jnp.float32) * 0.1
    up_w = jax.random.normal(k_uw, (up_dim, rank), jnp.float32) * 0.1
    weight_embedding = jnp.concatenate([down_w.reshape(-1), up_w.reshape(-1)])

    x = jax.random.normal(k_x, (batch, seq, in_features), jnp.float32)

    # One-time setup (cached across forwards), then the Pallas hot path.
    downt, upt, n_out = prepare_lora_factors(
        weight_embedding, down_aux, up_aux, rank, down_dim, up_dim,
        network_alpha=network_alpha, compute_dtype=jnp.bfloat16)
    out = lora_linear_forward(x, downt, upt, n_out)
    out = jax.block_until_ready(out)

    # Reference (module semantics) in f32 math on the same bf16-rounded
    # operands (tolerances reflect bf16 compute / f32 accumulation).
    dw = weight_embedding[: down_dim * rank].reshape(rank, down_dim)
    uw = weight_embedding[down_dim * rank:].reshape(up_dim, rank)
    down_f = dw @ down_aux
    up_f = (up_aux @ uw) * (network_alpha / rank)
    xb = x.astype(jnp.bfloat16).astype(jnp.float32)
    db = down_f.astype(jnp.bfloat16).astype(jnp.float32)
    ub = up_f.astype(jnp.bfloat16).astype(jnp.float32)
    ref = (xb @ db.T) @ ub.T

    assert out.shape == (batch, seq, out_features)
    err = jnp.max(jnp.abs(out.astype(jnp.float32) - ref))
    assert jnp.allclose(out.astype(jnp.float32), ref, atol=3e-2, rtol=3e-2), \
        f"max abs err {err}"

    print("KERNEL_OK")
</pallas_src>

<mosaic_0001>
module attributes {stable_mosaic.version = 11 : i64} {
  func.func @_lora_kernel_fullk(%arg0: i32, %arg1: memref<16x32xf32, #tpu.memory_space<vmem>>, %arg2: memref<32x128xbf16, #tpu.memory_space<vmem>>, %arg3: memref<128x128xbf16, #tpu.memory_space<vmem>>, %arg4: memref<16x128xf32, #tpu.memory_space<vmem>>) attributes {dimension_semantics = [#tpu.dimension_semantics<parallel>], iteration_bounds = array<i64: 1>, scalar_prefetch = 0 : i64, scratch_operands = 0 : i64, tpu.core_type = #tpu.core_type<tc>, window_params = [{transform_indices = @transform_0, window_bounds = array<i64: 16, 32>}, {pipeline_mode = #tpu.pipeline_mode<synchronous>, transform_indices = @transform_1, window_bounds = array<i64: 32, 128>}, {pipeline_mode = #tpu.pipeline_mode<synchronous>, transform_indices = @transform_2, window_bounds = array<i64: 128, 128>}, {transform_indices = @transform_3, window_bounds = array<i64: 16, 128>}]} {
    %c0 = arith.constant 0 : index
    %c0_0 = arith.constant 0 : index
    %0 = vector.load %arg1[%c0, %c0_0] : memref<16x32xf32, #tpu.memory_space<vmem>>, vector<16x32xf32>
    %1 = arith.truncf %0 : vector<16x32xf32> to vector<16x32xbf16>
    %c0_1 = arith.constant 0 : index
    %c0_2 = arith.constant 0 : index
    %2 = vector.load %arg2[%c0_1, %c0_2] : memref<32x128xbf16, #tpu.memory_space<vmem>>, vector<32x128xbf16>
    %cst = arith.constant dense<0.000000e+00> : vector<16x128xf32>
    %3 = tpu.matmul %1, %2, %cst {dimension_numbers = #tpu.dot_dimension_numbers<[1], [0], [0], [1], [0, 0, 1, 1], [], []>} : vector<16x32xbf16>, vector<32x128xbf16>, vector<16x128xf32> -> vector<16x128xf32>
    %4 = arith.truncf %3 : vector<16x128xf32> to vector<16x128xbf16>
    %c0_3 = arith.constant 0 : index
    %c0_4 = arith.constant 0 : index
    %5 = vector.load %arg3[%c0_3, %c0_4] : memref<128x128xbf16, #tpu.memory_space<vmem>>, vector<128x128xbf16>
    %cst_5 = arith.constant dense<0.000000e+00> : vector<16x128xf32>
    %6 = tpu.matmul %4, %5, %cst_5 {dimension_numbers = #tpu.dot_dimension_numbers<[1], [0], [0], [1], [0, 0, 1, 1], [], []>} : vector<16x128xbf16>, vector<128x128xbf16>, vector<16x128xf32> -> vector<16x128xf32>
    %c0_6 = arith.constant 0 : index
    %c0_7 = arith.constant 0 : index
    %7 = vector.load %arg4[%c0_6, %c0_7] : memref<16x128xf32, #tpu.memory_space<vmem>>, vector<16x128xf32>
    tpu.vector_store %arg4[%c0_6, %c0_7], %6 {strides = array<i32>} : memref<16x128xf32, #tpu.memory_space<vmem>>, vector<16x128xf32>,
    return
  }
  func.func @transform_0(%arg0: i32) -> (i32, i32) {
    %c0_i32 = arith.constant 0 : i32
    %c0_i32_0 = arith.constant 0 : i32
    return %arg0, %c0_i32 : i32, i32
  }
  func.func @transform_1(%arg0: i32) -> (i32, i32) {
    %c0_i32 = arith.constant 0 : i32
    %c0_i32_0 = arith.constant 0 : i32
    %c0_i32_1 = arith.constant 0 : i32
    return %c0_i32, %c0_i32_0 : i32, i32
  }
  func.func @transform_2(%arg0: i32) -> (i32, i32) {
    %c0_i32 = arith.constant 0 : i32
    %c0_i32_0 = arith.constant 0 : i32
    %c0_i32_1 = arith.constant 0 : i32
    return %c0_i32, %c0_i32_0 : i32, i32
  }
  func.func @transform_3(%arg0: i32) -> (i32, i32) {
    %c0_i32 = arith.constant 0 : i32
    %c0_i32_0 = arith.constant 0 : i32
    return %arg0, %c0_i32 : i32, i32
  }
}

</mosaic_0001>

<bundles_post_ra>
// kernel: tpu_custom_call.1
= control target key start
LH: loop header
LB: loop body
LE: loop exit
PB: predicated region body
PF: predicated region fallthrough
CT: control target
= control target key end

     0   :  { %8 = vsyncpa [#allocation3], 0  ;;  %s452_s0 = inlined_call_operand.hbm [shape: f32[16,32], index: 0, kind: input, shape index: {}]   ;;  %s453_s1 = inlined_call_operand.hbm [shape: bf16[32,128], index: 1, kind: input, shape index: {}]   ;;  %s454_s2 = inlined_call_operand.hbm [shape: bf16[128,128], index: 2, kind: input, shape index: {}]   ;;  %s455_s3 = inlined_call_operand.hbm [shape: f32[16,128], index: 3, kind: output, shape index: {}]  }
   0x1   :  { %9 = vsyncpa [#allocation6], 0 }
   0x2   :  { %10 = vsyncpa [#allocation4], 0  ;;  %s404_s12 = smov [#allocation5]  }
   0x3   :  { %s28_s13 = sshll.u32 %s404_s12, 4  ;;  %s29_s13 = int_to_ptr.vmem [resolvable:$true] %s28_s13 }
   0x4   :  { %s326_s14 = scalar_lea.vmem %s29_s13, 256  ;;  %p331_p1 = scmp.lt.s32.totalorder %s29_s13, %s29_s13 }
   0x5   :  { %p327_p0 = scmp.ne.s32.totalorder %s29_s13, %s326_s14  ;;  %p332_p2 = scmp.lt.s32.totalorder %s326_s14, %s326_s14 }
   0x7   :  { %p333_p3 = por %p332_p2, %p331_p1 }
   0x9   :  { %p334_p4 = pnand %p333_p3, %p327_p0 }
   0xb   :  { %337 = shalt.err (!%p334_p4)
}
   0xc   :  { %s405_s15 = smov 64   ;;  %s406_s16 = smov 4  }
   0xd   :  { %34 = dma.hbm_to_vmem [thread:$0]  %s453_s1, 256, %s29_s13, [#allocation6], %s405_s15, %s405_s15, %s406_s16  }
   0xe   :  { %s407_s19 = smov [#allocation2]  }
   0xf   :  { %s16_s20 = sshll.u32 %s407_s19, 4  ;;  %s17_s20 = int_to_ptr.vmem [resolvable:$true] %s16_s20 }
  0x10   :  { %s346_s21 = scalar_lea.vmem %s17_s20, 256  ;;  %p351_p6 = scmp.lt.s32.totalorder %s17_s20, %s17_s20 }
  0x11   :  { %p347_p5 = scmp.ne.s32.totalorder %s17_s20, %s346_s21  ;;  %p352_p7 = scmp.lt.s32.totalorder %s346_s21, %s346_s21 }
  0x13   :  { %p353_p8 = por %p352_p7, %p351_p6 }
  0x15   :  { %p354_p9 = pnand %p353_p8, %p347_p5 }
  0x17   :  { %357 = shalt.err (!%p354_p9)
}
  0x18   :  { %s408_s22 = smov 128   ;;  %s409_s23 = smov 8  }
  0x19   :  { %22 = dma.hbm_to_vmem [thread:$0]  %s452_s0, 256, %s17_s20, [#allocation3], %s408_s22, %s408_s22, %s409_s23  }
  0x1a   :  { %s410_s1 = smov [#allocation7]  }
  0x1b   :  { %s40_s26 = sshll.u32 %s410_s1, 4  ;;  %s41_s26 = int_to_ptr.vmem [resolvable:$true] %s40_s26 }
  0x1c   :  { %s366_s27 = scalar_lea.vmem %s41_s26, 1024  ;;  %p371_p11 = scmp.lt.s32.totalorder %s41_s26, %s41_s26 }
  0x1d   :  { %p367_p10 = scmp.ne.s32.totalorder %s41_s26, %s366_s27  ;;  %p372_p12 = scmp.lt.s32.totalorder %s366_s27, %s366_s27 }
  0x1f   :  { %p373_p13 = por %p372_p12, %p371_p11 }
  0x21   :  { %p374_p0 = pnand %p373_p13, %p367_p10 }
  0x23   :  { %377 = shalt.err (!%p374_p0)
}
  0x24   :  { %46 = dma.hbm_to_vmem [thread:$0]  %s454_s2, 1024, %s41_s26, [#allocation6], %s405_s15, %s405_s15, %s406_s16  }
  0x25   :  { %398 = dma.done.wait [#allocation3], 256  }
  0x26   :  { %399 = vsyncadd [#allocation3], 4294967040 }
  0x27   :  { %400 = dma.done.wait [#allocation6], 1280  }
  0x28   :  { %401 = vsyncadd [#allocation6], 4294966016  ;;  %v411_v0 = vmov 0.0   ;;  %vm412_vm0 = vmmov 0   ;;  %v308_v1 = vld [vmem:[#allocation5 + $0x8] sm:$0xff]   ;;  %v309_v2 = vld [vmem:[#allocation5] sm:$0xff]  }
  0x29   :  { %270 = vmatprep.subr.bf16.mxu0 %v411_v0  ;;  %274 = vmatprep.mubr.msk.bf16.mxu0 %vm412_vm0, %v411_v0  ;;  %v57_v3 = vld [vmem:[#allocation2] sm:$0xff]  ;;  %v58_v4 = vld [vmem:[#allocation2 + $0x8] sm:$0xff]  ;;  %v310_v5 = vld [vmem:[#allocation7 + $0x38] sm:$0xff]   ;;  %vm76_vm1 = vcmask 261120   ;;  %s413_s0 = smov [#allocation8]  }
  0x2a   :  { %278 = vmatprep.subr.bf16.mxu1 %v411_v0  ;;  %294 = vmatprep.mubr.msk.bf16.mxu1 %vm412_vm0, %v411_v0  ;;  %v59_v6 = vpack.c.bf16 %v58_v4, %v57_v3  ;;  %v311_v7 = vld [vmem:[#allocation7 + $0x30] sm:$0xff]   ;;  %v312_v8 = vld [vmem:[#allocation7 + $0x28] sm:$0xff]   ;;  %v313_v9 = vld [vmem:[#allocation7 + $0x20] sm:$0xff]   ;;  %s234_s2 = sshll.u32 %s413_s0, 4  ;;  %s235_s2 = int_to_ptr.vmem [resolvable:$true] %s234_s2 }
  0x2b   :  { %271 = vmatpush3.bf16.msra.mxu0 %v308_v1  ;;  %279 = vmatpush3.bf16.msra.mxu1 %v310_v5  ;;  %v314_v10 = vld [vmem:[#allocation7 + $0x18] sm:$0xff]   ;;  %v315_v11 = vld [vmem:[#allocation7 + $0x10] sm:$0xff]   ;;  %v316_v12 = vld [vmem:[#allocation7 + $0x8] sm:$0xff]   ;;  %s378_s30 = scalar_lea.vmem %s235_s2, 256  ;;  %p383_p2 = scmp.lt.s32.totalorder %s235_s2, %s235_s2 }
  0x2c   :  { %272 = vmatprep.subr.bf16.mxu0 %v411_v0  ;;  %280 = vmatprep.subr.bf16.mxu1 %v411_v0  ;;  %v317_v13 = vld [vmem:[#allocation7] sm:$0xff]   ;;  %p379_p1 = scmp.ne.s32.totalorder %s235_s2, %s378_s30  ;;  %p384_p3 = scmp.lt.s32.totalorder %s378_s30, %s378_s30 }
  0x2e   :  { %p385_p4 = por %p384_p3, %p383_p2 }
  0x2f   :  { %273 = vmatpush3.bf16.msra.mxu0 %v309_v2  ;;  %281 = vmatpush3.bf16.msra.mxu1 %v311_v7 }
  0x30   :  { %282 = vmatprep.subr.bf16.mxu1 %v411_v0  ;;  %p386_p5 = pnand %p385_p4, %p379_p1 }
  0x32   :  { %275 = vmatmul.mubr.msk.bf16.vlgmr.msra.gmra.mxu0 %vm76_vm1, %v59_v6 }
  0x33   :  { %283 = vmatpush3.bf16.msra.mxu1 %v312_v8 }
  0x34   :  { %284 = vmatprep.subr.bf16.mxu1 %v411_v0 }
  0x37   :  { %285 = vmatpush3.bf16.msra.mxu1 %v313_v9 }
  0x38   :  { %286 = vmatprep.subr.bf16.mxu1 %v411_v0 }
  0x3b   :  { %287 = vmatpush3.bf16.msra.mxu1 %v314_v10 }
  0x3c   :  { %288 = vmatprep.subr.bf16.mxu1 %v411_v0 }
  0x3f   :  { %289 = vmatpush3.bf16.msra.mxu1 %v315_v11 }
  0x40   :  { %290 = vmatprep.subr.bf16.mxu1 %v411_v0 }
  0x43   :  { %291 = vmatpush3.bf16.msra.mxu1 %v316_v12 }
  0x44   :  { %292 = vmatprep.subr.bf16.mxu1 %v411_v0 }
  0x47   :  { %293 = vmatpush3.bf16.msra.mxu1 %v317_v13 }
  0xf2   :  { %v114_v14 = vpop.f32.mrf.mxu0 }
  0xf4   :  { %v276_v15 = vpop.f32.mrf.mxu0 }
  0xf6   :  { %v117_v16 = vpop.f32.mrf.mxu0 }
  0xf7   :  { %v121_v17 = vpack.c.bf16 %v117_v16, %v114_v14 }
  0xf8   :  { %v277_v18 = vpop.f32.mrf.mxu0 }
  0xf9   :  { %295 = vmatmul.mubr.bf16.vlgmr.msra.gmra.mxu1 %v121_v17 }
 0x1b9   :  { %v220_v19 = vpop.f32.mrf.mxu1 }
 0x1ba   :  { %227 = vst [vmem:[#allocation8] sm:$0xff] %v220_v19 }
 0x1bb   :  { %v296_v20 = vpop.f32.mrf.mxu1 }
 0x1bd   :  { %v223_v21 = vpop.f32.mrf.mxu1 }
 0x1be   :  { %228 = vst [vmem:[#allocation8 + $0x8] sm:$0xff] %v223_v21 }
 0x1bf   :  { %v297_v22 = vpop.f32.mrf.mxu1 }
 0x1c0   :  { %389 = shalt.err (!%p386_p5)
}
 0x1c1   :  { %240 = dma.vmem_to_hbm [thread:$0]  %s235_s2, 256, %s455_s3, [#allocation4], %s408_s22, %s408_s22, %s409_s23  }
 0x1c2   :  { %402 = dma.done.wait [#allocation4], 256  }
 0x1c3   :  { %403 = vsyncadd [#allocation4], 4294967040 }
 0x1c4   :  { %244 = vsyncpa [#allocation3], 1 }
 0x1c5   :  { %245 = vsyncpa [#allocation6], 1 }
 0x1c6   :  { %246 = vsyncpa [#allocation4], 1 }

</bundles_post_ra>
